<compile_context>
chip_gen: v5e
topology: v5e:2x2
jax: 0.10.0
libtpu: 0.0.40
codegen_flags: <defaults>
</compile_context>

<pallas_src>
import functools

import jax
import jax.numpy as jnp
from jax.experimental import pallas as pl
from jax.experimental.pallas import tpu as pltpu

LANE = 128
RESIDENT_XW_CAP_BYTES = 16 * 1024 * 1024   # beyond this, stream XW per K-tile
VMEM_CEIL_BYTES = 60 * 1024 * 1024         # stay under v7x's 64 MiB physical VMEM


def _round_up(x, m):
    return (x + m - 1) // m * m


def _choose_tiles(n):
    """MXU/lane-aligned tile size + padded node count (even #row-tiles)."""
    if n >= 8192:
        tile = 1024
    elif n >= 2048:
        tile = 512
    elif n >= 512:
        tile = 256
    else:
        tile = 128
    # >= 2 (and even) row tiles so the "parallel" i-axis balances across the
    # two TensorCores on v7x; harmless on single-TC v5e/v6e.
    n_pad = _round_up(max(n, 2 * tile), 2 * tile)
    return tile, n_pad


def _vmem_limit(*buffer_bytes):
    need = sum(int(b) for b in buffer_bytes)
    return int(min(max(int(1.5 * need) + (4 << 20), 16 << 20), VMEM_CEIL_BYTES))


# ---------------------------------------------------------------------------
# Kernel 1: XW = X @ W   (computed once per layer, tiled over node rows)
# ---------------------------------------------------------------------------
def _xw_kernel(x_ref, w_ref, o_ref):
    o_ref[...] = jnp.dot(
        x_ref[...], w_ref[...], preferred_element_type=jnp.float32
    ).astype(o_ref.dtype)


def feature_transform(x, w, *, tile_m):
    n, f_in = x.shape
    f_out = w.shape[1]
    assert n % tile_m == 0
    vmem = _vmem_limit(2 * tile_m * f_in * 2,     # X row-tile double-buffer
                       2 * f_in * f_out * 2,      # W
                       2 * tile_m * f_out * 2)    # output double-buffer
    return pl.pallas_call(
        _xw_kernel,
        out_shape=jax.ShapeDtypeStruct((n, f_out), jnp.bfloat16),
        grid=(n // tile_m,),
        in_specs=[
            pl.BlockSpec((tile_m, f_in), lambda i: (i, 0)),   # X row tile
            pl.BlockSpec((f_in, f_out), lambda i: (0, 0)),    # W (full, small)
        ],
        out_specs=pl.BlockSpec((tile_m, f_out), lambda i: (i, 0)),
        compiler_params=pltpu.CompilerParams(
            dimension_semantics=("parallel",),
            vmem_limit_bytes=vmem),
    )(x, w)


# ---------------------------------------------------------------------------
# Kernel 2: out = Ahat @ XW + b (+ ReLU), K-tiled over the node dimension.
# XW is VMEM-resident (constant-index BlockSpec) whenever it fits the budget.
# ---------------------------------------------------------------------------
def _agg_kernel(a_ref, xw_ref, b_ref, o_ref, acc_ref, *,
                apply_relu, tile_k, resident):
    k = pl.program_id(1)

    @pl.when(k == 0)
    def _():
        acc_ref[...] = jnp.zeros_like(acc_ref)

    if resident:
        start = pl.multiple_of(k * tile_k, tile_k)
        xw_k = xw_ref[pl.ds(start, tile_k), :]
    else:
        xw_k = xw_ref[...]

    acc_ref[...] += jnp.dot(
        a_ref[...], xw_k, preferred_element_type=jnp.float32)

    @pl.when(k == pl.num_programs(1) - 1)
    def _():
        out = acc_ref[...] + b_ref[...]
        if apply_relu:
            out = jnp.maximum(out, 0.0)
        o_ref[...] = out.astype(o_ref.dtype)


def aggregate(a_hat, xw, b, *, apply_relu, tile_m, tile_k, out_dtype):
    n = a_hat.shape[0]
    f_out = xw.shape[1]
    assert n % tile_m == 0 and n % tile_k == 0

    xw_bytes = n * f_out * jnp.dtype(xw.dtype).itemsize
    resident = xw_bytes <= RESIDENT_XW_CAP_BYTES

    if resident:
        # Full-array, constant-index spec: DMA'd once, never re-streamed.
        xw_spec = pl.BlockSpec((n, f_out), lambda i, k: (0, 0))
        xw_buf_bytes = 2 * xw_bytes            # worst case two pipeline copies
    else:
        xw_spec = pl.BlockSpec((tile_k, f_out), lambda i, k: (k, 0))
        xw_buf_bytes = 2 * tile_k * f_out * jnp.dtype(xw.dtype).itemsize

    out_itemsize = jnp.dtype(out_dtype).itemsize
    vmem = _vmem_limit(2 * tile_m * tile_k * 2,        # Ahat double-buffer
                       xw_buf_bytes,                   # XW
                       tile_m * f_out * 4,             # fp32 accumulator
                       2 * tile_m * f_out * out_itemsize,   # out double-buffer
                       2 * f_out * 4)                  # bias

    kernel = functools.partial(_agg_kernel, apply_relu=apply_relu,
                               tile_k=tile_k, resident=resident)
    return pl.pallas_call(
        kernel,
        out_shape=jax.ShapeDtypeStruct((n, f_out), out_dtype),
        grid=(n // tile_m, n // tile_k),
        in_specs=[
            pl.BlockSpec((tile_m, tile_k), lambda i, k: (i, k)),  # Ahat tile
            xw_spec,                                              # XW
            pl.BlockSpec((1, f_out), lambda i, k: (0, 0)),        # bias
        ],
        out_specs=pl.BlockSpec((tile_m, f_out), lambda i, k: (i, 0)),
        scratch_shapes=[pltpu.VMEM((tile_m, f_out), jnp.float32)],
        compiler_params=pltpu.CompilerParams(
            dimension_semantics=("parallel", "arbitrary"),
            vmem_limit_bytes=vmem),
    )(a_hat, xw, b)


def gcn_layer(a_hat_bf16, x_bf16, w_bf16, b_f32, *, apply_relu, tile_m, tile_k,
              out_dtype):
    xw = feature_transform(x_bf16, w_bf16, tile_m=tile_m)
    return aggregate(a_hat_bf16, xw, b_f32, apply_relu=apply_relu,
                     tile_m=tile_m, tile_k=tile_k, out_dtype=out_dtype)


# ---------------------------------------------------------------------------
# Glue: dense, symmetrically-normalized adjacency (plain JAX), zero-padded.
# Self-loops follow add_remaining_self_loops semantics (no double counting).
# ---------------------------------------------------------------------------
def build_norm_adj(edge_index, edge_weight, num_nodes, num_nodes_pad):
    src = edge_index[0]
    dst = edge_index[1]
    w = edge_weight.astype(jnp.float32)

    # Dense weighted adjacency; message flows src -> dst, so A[dst, src] += w.
    # Duplicate edges accumulate exactly (fp32 scatter), matching scatter_add.
    a = jnp.zeros((num_nodes_pad, num_nodes_pad), jnp.float32)
    a = a.at[dst, src].add(w)

    # Add weight-1 self loops only for nodes that don't already have one.
    loop_w = jnp.zeros((num_nodes,), jnp.float32).at[src].add(
        jnp.where(src == dst, 1.0, 0.0))
    add_loop = jnp.where(loop_w > 0.0, 0.0, 1.0)
    idx = jnp.arange(num_nodes)
    a = a.at[idx, idx].add(add_loop)

    # Symmetric normalization; padded rows/cols have deg 0 -> stay exactly 0.
    deg = jnp.sum(a, axis=1)
    dinv_sqrt = jnp.where(deg > 0, jax.lax.rsqrt(deg), 0.0)
    a_hat = a * dinv_sqrt[:, None] * dinv_sqrt[None, :]
    return a_hat


# ---------------------------------------------------------------------------
# Forward:  h = relu(gcn1(x)),  z = out(h)
# ---------------------------------------------------------------------------
def gcn_diff_forward(params, x, edge_index, edge_weight, *, hidden, n_classes):
    n, f_in = x.shape

    tile, n_pad = _choose_tiles(n)
    f_in_pad = _round_up(f_in, LANE)
    hid_pad = _round_up(hidden, LANE)
    cls_pad = _round_up(n_classes, LANE)

    # Zero-pad everything to lane-dense, tile-aligned shapes.
    x_p = jnp.zeros((n_pad, f_in_pad), jnp.bfloat16)
    x_p = x_p.at[:n, :f_in].set(x.astype(jnp.bfloat16))
    w1_p = jnp.zeros((f_in_pad, hid_pad), jnp.bfloat16)
    w1_p = w1_p.at[:f_in, :hidden].set(params["w1"].astype(jnp.bfloat16))
    b1_p = jnp.zeros((1, hid_pad), jnp.float32).at[:, :hidden].set(params["b1"])
    w2_p = jnp.zeros((hid_pad, cls_pad), jnp.bfloat16)
    w2_p = w2_p.at[:hidden, :n_classes].set(params["w2"].astype(jnp.bfloat16))
    b2_p = jnp.zeros((1, cls_pad), jnp.float32).at[:, :n_classes].set(params["b2"])

    a_hat = build_norm_adj(edge_index, edge_weight, n, n_pad).astype(jnp.bfloat16)

    # Layer 1 emits bf16 directly: halves the writeback and feeds layer 2
    # without a standalone fp32->bf16 cast round-trip through HBM.
    h_p = gcn_layer(a_hat, x_p, w1_p, b1_p,
                    apply_relu=True, tile_m=tile, tile_k=tile,
                    out_dtype=jnp.bfloat16)
    z_p = gcn_layer(a_hat, h_p, w2_p, b2_p,
                    apply_relu=False, tile_m=tile, tile_k=tile,
                    out_dtype=jnp.float32)

    return h_p[:n, :hidden].astype(jnp.float32), z_p[:n, :n_classes]


def init_params(key, f_in, hidden, n_classes):
    k1, k2 = jax.random.split(key)

    def glorot(k, fan_in, fan_out):
        lim = jnp.sqrt(6.0 / (fan_in + fan_out))
        return jax.random.uniform(k, (fan_in, fan_out), jnp.float32, -lim, lim)

    return {
        "w1": glorot(k1, f_in, hidden),
        "b1": jnp.zeros((1, hidden), jnp.float32),
        "w2": glorot(k2, hidden, n_classes),
        "b2": jnp.zeros((1, n_classes), jnp.float32),
    }


if __name__ == "__main__":
    # Small Cora-like synthetic problem: hidden=16 (as in the module), 7 classes.
    N, F_IN, HIDDEN, N_CLASSES, E = 200, 32, 16, 7, 600

    key = jax.random.PRNGKey(0)
    k_x, k_e, k_w, k_p = jax.random.split(key, 4)

    x = jax.random.normal(k_x, (N, F_IN), jnp.float32)
    edge_index = jax.random.randint(k_e, (2, E), 0, N, dtype=jnp.int32)
    edge_weight = jax.random.uniform(k_w, (E,), jnp.float32)

    params = init_params(k_p, F_IN, HIDDEN, N_CLASSES)

    fwd = jax.jit(functools.partial(gcn_diff_forward,
                                    hidden=HIDDEN, n_classes=N_CLASSES))
    h, z = fwd(params, x, edge_index, edge_weight)
    jax.block_until_ready((h, z))

    assert h.shape == (N, HIDDEN)
    assert z.shape == (N, N_CLASSES)
    assert bool(jnp.all(h >= 0.0))  # ReLU applied in first layer
    assert bool(jnp.all(jnp.isfinite(z)))

    print("KERNEL_OK")
</pallas_src>

<mosaic_0001>
module attributes {stable_mosaic.version = 11 : i64} {
  func.func @_xw_kernel(%arg0: i32, %arg1: memref<128x128xbf16, #tpu.memory_space<vmem>>, %arg2: memref<128x128xbf16, #tpu.memory_space<vmem>>, %arg3: memref<128x128xbf16, #tpu.memory_space<vmem>>) attributes {dimension_semantics = [#tpu.dimension_semantics<parallel>], iteration_bounds = array<i64: 2>, scalar_prefetch = 0 : i64, scratch_operands = 0 : i64, tpu.core_type = #tpu.core_type<tc>, window_params = [{transform_indices = @transform_0, window_bounds = array<i64: 128, 128>}, {pipeline_mode = #tpu.pipeline_mode<synchronous>, transform_indices = @transform_1, window_bounds = array<i64: 128, 128>}, {transform_indices = @transform_2, window_bounds = array<i64: 128, 128>}]} {
    %c0 = arith.constant 0 : index
    %c0_0 = arith.constant 0 : index
    %0 = vector.load %arg1[%c0, %c0_0] : memref<128x128xbf16, #tpu.memory_space<vmem>>, vector<128x128xbf16>
    %c0_1 = arith.constant 0 : index
    %c0_2 = arith.constant 0 : index
    %1 = vector.load %arg2[%c0_1, %c0_2] : memref<128x128xbf16, #tpu.memory_space<vmem>>, vector<128x128xbf16>
    %cst = arith.constant dense<0.000000e+00> : vector<128x128xf32>
    %2 = tpu.matmul %0, %1, %cst {dimension_numbers = #tpu.dot_dimension_numbers<[1], [0], [0], [1], [0, 0, 1, 1], [], []>} : vector<128x128xbf16>, vector<128x128xbf16>, vector<128x128xf32> -> vector<128x128xf32>
    %3 = arith.truncf %2 : vector<128x128xf32> to vector<128x128xbf16>
    %c0_3 = arith.constant 0 : index
    %c0_4 = arith.constant 0 : index
    %4 = vector.load %arg3[%c0_3, %c0_4] : memref<128x128xbf16, #tpu.memory_space<vmem>>, vector<128x128xbf16>
    tpu.vector_store %arg3[%c0_3, %c0_4], %3 {strides = array<i32>} : memref<128x128xbf16, #tpu.memory_space<vmem>>, vector<128x128xbf16>,
    return
  }
  func.func @transform_0(%arg0: i32) -> (i32, i32) {
    %c0_i32 = arith.constant 0 : i32
    %c0_i32_0 = arith.constant 0 : i32
    return %arg0, %c0_i32 : i32, i32
  }
  func.func @transform_1(%arg0: i32) -> (i32, i32) {
    %c0_i32 = arith.constant 0 : i32
    %c0_i32_0 = arith.constant 0 : i32
    %c0_i32_1 = arith.constant 0 : i32
    return %c0_i32, %c0_i32_0 : i32, i32
  }
  func.func @transform_2(%arg0: i32) -> (i32, i32) {
    %c0_i32 = arith.constant 0 : i32
    %c0_i32_0 = arith.constant 0 : i32
    return %arg0, %c0_i32 : i32, i32
  }
}

module attributes {stable_mosaic.version = 11 : i64} {
  func.func @_agg_kernel(%arg0: i32, %arg1: i32, %arg2: memref<128x128xbf16, #tpu.memory_space<vmem>>, %arg3: memref<256x128xbf16, #tpu.memory_space<vmem>>, %arg4: memref<1x128xf32, #tpu.memory_space<vmem>>, %arg5: memref<128x128xbf16, #tpu.memory_space<vmem>>, %arg6: memref<128x128xf32, #tpu.memory_space<vmem>>) attributes {dimension_semantics = [#tpu.dimension_semantics<parallel>, #tpu.dimension_semantics<arbitrary>], iteration_bounds = array<i64: 2, 2>, scalar_prefetch = 0 : i64, scratch_operands = 1 : i64, tpu.core_type = #tpu.core_type<tc>, window_params = [{transform_indices = @transform_0, window_bounds = array<i64: 128, 128>}, {pipeline_mode = #tpu.pipeline_mode<synchronous>, transform_indices = @transform_1, window_bounds = array<i64: 256, 128>}, {pipeline_mode = #tpu.pipeline_mode<synchronous>, transform_indices = @transform_2, window_bounds = array<i64: 1, 128>}, {transform_indices = @transform_3, window_bounds = array<i64: 128, 128>}]} {
    %c0_i32 = arith.constant 0 : i32
    %0 = arith.cmpi eq, %arg1, %c0_i32 : i32
    %1 = arith.extui %0 : i1 to i32
    %c0_i32_0 = arith.constant 0 : i32
    %2 = arith.cmpi ne, %1, %c0_i32_0 : i32
    scf.if %2 {
      %cst_8 = arith.constant 0.000000e+00 : f32
      %15 = vector.broadcast %cst_8 : f32 to vector<128x128xf32>
      %c0_9 = arith.constant 0 : index
      %c0_10 = arith.constant 0 : index
      %16 = vector.load %arg6[%c0_9, %c0_10] : memref<128x128xf32, #tpu.memory_space<vmem>>, vector<128x128xf32>
      tpu.vector_store %arg6[%c0_9, %c0_10], %15 {strides = array<i32>} : memref<128x128xf32, #tpu.memory_space<vmem>>, vector<128x128xf32>,
    } else {
    }
    %c128_i32 = arith.constant 128 : i32
    %3 = arith.muli %arg1, %c128_i32 : i32
    %4 = tpu.assume_multiple %3, 128 : i32
    %5 = arith.index_cast %4 : i32 to index
    %c0 = arith.constant 0 : index
    %6 = vector.load %arg3[%5, %c0] : memref<256x128xbf16, #tpu.memory_space<vmem>>, vector<128x128xbf16>
    %c0_1 = arith.constant 0 : index
    %c0_2 = arith.constant 0 : index
    %7 = vector.load %arg6[%c0_1, %c0_2] : memref<128x128xf32, #tpu.memory_space<vmem>>, vector<128x128xf32>
    %c0_3 = arith.constant 0 : index
    %c0_4 = arith.constant 0 : index
    %8 = vector.load %arg2[%c0_3, %c0_4] : memref<128x128xbf16, #tpu.memory_space<vmem>>, vector<128x128xbf16>
    %cst = arith.constant dense<0.000000e+00> : vector<128x128xf32>
    %9 = tpu.matmul %8, %6, %cst {dimension_numbers = #tpu.dot_dimension_numbers<[1], [0], [0], [1], [0, 0, 1, 1], [], []>} : vector<128x128xbf16>, vector<128x128xbf16>, vector<128x128xf32> -> vector<128x128xf32>
    %10 = arith.addf %7, %9 : vector<128x128xf32>
    %c0_5 = arith.constant 0 : index
    %c0_6 = arith.constant 0 : index
    %11 = vector.load %arg6[%c0_5, %c0_6] : memref<128x128xf32, #tpu.memory_space<vmem>>, vector<128x128xf32>
    tpu.vector_store %arg6[%c0_5, %c0_6], %10 {strides = array<i32>} : memref<128x128xf32, #tpu.memory_space<vmem>>, vector<128x128xf32>,
    %c1_i32 = arith.constant 1 : i32
    %12 = arith.cmpi eq, %arg1, %c1_i32 : i32
    %13 = arith.extui %12 : i1 to i32
    %c0_i32_7 = arith.constant 0 : i32
    %14 = arith.cmpi ne, %13, %c0_i32_7 : i32
    scf.if %14 {
      %c0_8 = arith.constant 0 : index
      %c0_9 = arith.constant 0 : index
      %15 = vector.load %arg6[%c0_8, %c0_9] : memref<128x128xf32, #tpu.memory_space<vmem>>, vector<128x128xf32>
      %c0_10 = arith.constant 0 : index
      %c0_11 = arith.constant 0 : index
      %16 = vector.load %arg4[%c0_10, %c0_11] : memref<1x128xf32, #tpu.memory_space<vmem>>, vector<1x128xf32>
      %17 = vector.broadcast %16 : vector<1x128xf32> to vector<128x128xf32>
      %18 = arith.addf %15, %17 : vector<128x128xf32>
      %cst_12 = arith.constant 0.000000e+00 : f32
      %19 = vector.broadcast %cst_12 : f32 to vector<128x128xf32>
      %20 = arith.maximumf %18, %19 : vector<128x128xf32>
      %21 = arith.truncf %20 : vector<128x128xf32> to vector<128x128xbf16>
      %c0_13 = arith.constant 0 : index
      %c0_14 = arith.constant 0 : index
      %22 = vector.load %arg5[%c0_13, %c0_14] : memref<128x128xbf16, #tpu.memory_space<vmem>>, vector<128x128xbf16>
      tpu.vector_store %arg5[%c0_13, %c0_14], %21 {strides = array<i32>} : memref<128x128xbf16, #tpu.memory_space<vmem>>, vector<128x128xbf16>,
    } else {
    }
    return
  }
  func.func @transform_0(%arg0: i32, %arg1: i32) -> (i32, i32) {
    %c0_i32 = arith.constant 0 : i32
    return %arg0, %arg1 : i32, i32
  }
  func.func @transform_1(%arg0: i32, %arg1: i32) -> (i32, i32) {
    %c0_i32 = arith.constant 0 : i32
    %c0_i32_0 = arith.constant 0 : i32
    %c0_i32_1 = arith.constant 0 : i32
    return %c0_i32, %c0_i32_0 : i32, i32
  }
  func.func @transform_2(%arg0: i32, %arg1: i32) -> (i32, i32) {
    %c0_i32 = arith.constant 0 : i32
    %c0_i32_0 = arith.constant 0 : i32
    %c0_i32_1 = arith.constant 0 : i32
    return %c0_i32, %c0_i32_0 : i32, i32
  }
  func.func @transform_3(%arg0: i32, %arg1: i32) -> (i32, i32) {
    %c0_i32 = arith.constant 0 : i32
    %c0_i32_0 = arith.constant 0 : i32
    return %arg0, %c0_i32 : i32, i32
  }
}

module attributes {stable_mosaic.version = 11 : i64} {
  func.func @_agg_kernel(%arg0: i32, %arg1: i32, %arg2: memref<128x128xbf16, #tpu.memory_space<vmem>>, %arg3: memref<256x128xbf16, #tpu.memory_space<vmem>>, %arg4: memref<1x128xf32, #tpu.memory_space<vmem>>, %arg5: memref<128x128xf32, #tpu.memory_space<vmem>>, %arg6: memref<128x128xf32, #tpu.memory_space<vmem>>) attributes {dimension_semantics = [#tpu.dimension_semantics<parallel>, #tpu.dimension_semantics<arbitrary>], iteration_bounds = array<i64: 2, 2>, scalar_prefetch = 0 : i64, scratch_operands = 1 : i64, tpu.core_type = #tpu.core_type<tc>, window_params = [{transform_indices = @transform_0, window_bounds = array<i64: 128, 128>}, {pipeline_mode = #tpu.pipeline_mode<synchronous>, transform_indices = @transform_1, window_bounds = array<i64: 256, 128>}, {pipeline_mode = #tpu.pipeline_mode<synchronous>, transform_indices = @transform_2, window_bounds = array<i64: 1, 128>}, {transform_indices = @transform_3, window_bounds = array<i64: 128, 128>}]} {
    %c0_i32 = arith.constant 0 : i32
    %0 = arith.cmpi eq, %arg1, %c0_i32 : i32
    %1 = arith.extui %0 : i1 to i32
    %c0_i32_0 = arith.constant 0 : i32
    %2 = arith.cmpi ne, %1, %c0_i32_0 : i32
    scf.if %2 {
      %cst_8 = arith.constant 0.000000e+00 : f32
      %15 = vector.broadcast %cst_8 : f32 to vector<128x128xf32>
      %c0_9 = arith.constant 0 : index
      %c0_10 = arith.constant 0 : index
      %16 = vector.load %arg6[%c0_9, %c0_10] : memref<128x128xf32, #tpu.memory_space<vmem>>, vector<128x128xf32>
      tpu.vector_store %arg6[%c0_9, %c0_10], %15 {strides = array<i32>} : memref<128x128xf32, #tpu.memory_space<vmem>>, vector<128x128xf32>,
    } else {
    }
    %c128_i32 = arith.constant 128 : i32
    %3 = arith.muli %arg1, %c128_i32 : i32
    %4 = tpu.assume_multiple %3, 128 : i32
    %5 = arith.index_cast %4 : i32 to index
    %c0 = arith.constant 0 : index
    %6 = vector.load %arg3[%5, %c0] : memref<256x128xbf16, #tpu.memory_space<vmem>>, vector<128x128xbf16>
    %c0_1 = arith.constant 0 : index
    %c0_2 = arith.constant 0 : index
    %7 = vector.load %arg6[%c0_1, %c0_2] : memref<128x128xf32, #tpu.memory_space<vmem>>, vector<128x128xf32>
    %c0_3 = arith.constant 0 : index
    %c0_4 = arith.constant 0 : index
    %8 = vector.load %arg2[%c0_3, %c0_4] : memref<128x128xbf16, #tpu.memory_space<vmem>>, vector<128x128xbf16>
    %cst = arith.constant dense<0.000000e+00> : vector<128x128xf32>
    %9 = tpu.matmul %8, %6, %cst {dimension_numbers = #tpu.dot_dimension_numbers<[1], [0], [0], [1], [0, 0, 1, 1], [], []>} : vector<128x128xbf16>, vector<128x128xbf16>, vector<128x128xf32> -> vector<128x128xf32>
    %10 = arith.addf %7, %9 : vector<128x128xf32>
    %c0_5 = arith.constant 0 : index
    %c0_6 = arith.constant 0 : index
    %11 = vector.load %arg6[%c0_5, %c0_6] : memref<128x128xf32, #tpu.memory_space<vmem>>, vector<128x128xf32>
    tpu.vector_store %arg6[%c0_5, %c0_6], %10 {strides = array<i32>} : memref<128x128xf32, #tpu.memory_space<vmem>>, vector<128x128xf32>,
    %c1_i32 = arith.constant 1 : i32
    %12 = arith.cmpi eq, %arg1, %c1_i32 : i32
    %13 = arith.extui %12 : i1 to i32
    %c0_i32_7 = arith.constant 0 : i32
    %14 = arith.cmpi ne, %13, %c0_i32_7 : i32
    scf.if %14 {
      %c0_8 = arith.constant 0 : index
      %c0_9 = arith.constant 0 : index
      %15 = vector.load %arg6[%c0_8, %c0_9] : memref<128x128xf32, #tpu.memory_space<vmem>>, vector<128x128xf32>
      %c0_10 = arith.constant 0 : index
      %c0_11 = arith.constant 0 : index
      %16 = vector.load %arg4[%c0_10, %c0_11] : memref<1x128xf32, #tpu.memory_space<vmem>>, vector<1x128xf32>
      %17 = vector.broadcast %16 : vector<1x128xf32> to vector<128x128xf32>
      %18 = arith.addf %15, %17 : vector<128x128xf32>
      %c0_12 = arith.constant 0 : index
      %c0_13 = arith.constant 0 : index
      %19 = vector.load %arg5[%c0_12, %c0_13] : memref<128x128xf32, #tpu.memory_space<vmem>>, vector<128x128xf32>
      tpu.vector_store %arg5[%c0_12, %c0_13], %18 {strides = array<i32>} : memref<128x128xf32, #tpu.memory_space<vmem>>, vector<128x128xf32>,
    } else {
    }
    return
  }
  func.func @transform_0(%arg0: i32, %arg1: i32) -> (i32, i32) {
    %c0_i32 = arith.constant 0 : i32
    return %arg0, %arg1 : i32, i32
  }
  func.func @transform_1(%arg0: i32, %arg1: i32) -> (i32, i32) {
    %c0_i32 = arith.constant 0 : i32
    %c0_i32_0 = arith.constant 0 : i32
    %c0_i32_1 = arith.constant 0 : i32
    return %c0_i32, %c0_i32_0 : i32, i32
  }
  func.func @transform_2(%arg0: i32, %arg1: i32) -> (i32, i32) {
    %c0_i32 = arith.constant 0 : i32
    %c0_i32_0 = arith.constant 0 : i32
    %c0_i32_1 = arith.constant 0 : i32
    return %c0_i32, %c0_i32_0 : i32, i32
  }
  func.func @transform_3(%arg0: i32, %arg1: i32) -> (i32, i32) {
    %c0_i32 = arith.constant 0 : i32
    %c0_i32_0 = arith.constant 0 : i32
    return %arg0, %c0_i32 : i32, i32
  }
}

</mosaic_0001>

<bundles_post_ra>
// kernel: gcn_diff_forward.7
= control target key start
LH: loop header
LB: loop body
LE: loop exit
PB: predicated region body
PF: predicated region fallthrough
CT: control target
= control target key end

     0   :  { %s935_s12 = smov 0   ;;  %s937_s13 = smov 0   ;;  %s1088_s0 = inlined_call_operand.vmem [shape: bf16[256,256], index: 0, kind: input, shape index: {}]   ;;  %s1089_s1 = inlined_call_operand.vmem [shape: bf16[256,128], index: 1, kind: input, shape index: {}]   ;;  %s1090_s2 = inlined_call_operand.vmem [shape: f32[1,128], index: 2, kind: input, shape index: {}]   ;;  %s1091_s3 = inlined_call_operand.vmem [shape: f32[256,128], index: 3, kind: output, shape index: {}]  }
   0x1   :  { %s939_s14 = smov 0   ;;  %s941_s15 = smov 0  }
   0x2   :  { %s943_s16 = smov 0   ;;  %s945_s17 = smov 0  }
   0x3   :  { %s947_s18 = smov 0  }
   0x4 LB: > { %s22_s19 = sadd.s32 1, %s904_s16  ;;  %s25_s20 = sadd.s32 1, %s908_s17  ;;  %s912_s18 = sphi %s947_s18, %s13_s18   ;;  %s908_s17 = sphi %s945_s17, %s1097_s17   ;;  %s904_s16 = sphi %s943_s16, %s1096_s16   ;;  %s900_s15 = sphi %s941_s15, %s1095_s15   ;;  %s896_s14 = sphi %s939_s14, %s1094_s14   ;;  %s892_s13 = sphi %s937_s13, %s1093_s13   ;;  %s888_s12 = sphi %s935_s12, %s1092_s12  }
   0x5   : > { %p23_p0 = scmp.ge.s32.totalorder %s22_s19, 2  ;;  %p41_p1 = scmp.ne.s32.totalorder %s892_s13, %s888_s12 }
   0x6   : > { %p42_p2 = scmp.eq.s32.totalorder %s912_s18, 0  ;;  %s34_s24 = sadd.s32 1, %s892_s13 }
   0x7   : > { %s1099_s19 = smov (%p23_p0, %s22_s19), 0  ;;  %s1101_s20 = smov (!%p23_p0, %s25_s20), %s908_s17 }
   0x8   : > { %p43_p3 = por %p42_p2, %p41_p1  ;;  %p27_p4 = scmp.ge.s32.totalorder %s1101_s20, 2 }
   0x9   : > { %s30_s21 = ssub.s32 %s904_s16, %s1099_s19  ;;  %p680_p6 = scmp.ge.s32.totalorder %s912_s18, 4 }
   0xa   : > { %s1103_s20 = smov (%p27_p4, %s1101_s20), 0 }
   0xb   : > { %s29_s22 = ssub.s32 %s908_s17, %s1103_s20  ;;  %141 = sbr.rel (%p680_p6) target bundleno = 38 (0x26), region = 24 }
   0xc   : > { %s31_s23 = sor.u32 %s30_s21, %s29_s22 }
   0xd   : > { %p32_p5 = scmp.eq.s32.totalorder %s31_s23, 0 }
   0xf   : > { %s986_s25 = scalar_select %p32_p5, %s892_s13, %s34_s24  }
  0x10   : > { %144 = sbr.rel (!%p43_p3) target bundleno = 38 (0x26), region = 28  ;;  %s146_s26 = sand.u32 (%p43_p3), 1, %s892_s13  }
  0x11   : > { %s759_s27 = sshll.u32 (%p43_p3), %s908_s17, 5  ;;  %s681_s28 = sshll.u32 (%p43_p3), %s146_s26, 6 }
  0x12   : > { %s151_s29 = sadd.s32 (%p43_p3), %s904_s16, %s759_s27  ;;  %s148_s7 = scalar_lea.vmem (%p43_p3), [#allocation3], %s681_s28 }
  0x13   : > { %s684_s30 = sshll.u32 (%p43_p3), %s151_s29, 2 }
  0x14   : > { %s995_s6 = scalar_lea.vmem (%p43_p3), %s1088_s0, %s684_s30 }
  0x15   : > { %v170_v0 = vld [vmem:[%s995_s6] sm:$0xf]  ;;  %v172_v1 = vld [vmem:[%s995_s6 + $0x8] sm:$0xf]  ;;  %v174_v2 = vld [vmem:[%s995_s6 + $0x10] sm:$0xf] }
  0x16   : > { %171 = vst [vmem:[%s148_s7] sm:$0xf] %v170_v0  ;;  %v176_v3 = vld [vmem:[%s995_s6 + $0x18] sm:$0xf]  ;;  %v178_v4 = vld [vmem:[%s995_s6 + $0x20] sm:$0xf] }
  0x17   : > { %173 = vst [vmem:[%s148_s7 + $0x4] sm:$0xf] %v172_v1  ;;  %v180_v5 = vld [vmem:[%s995_s6 + $0x28] sm:$0xf]  ;;  %v182_v6 = vld [vmem:[%s995_s6 + $0x30] sm:$0xf] }
  0x18   : > { %175 = vst [vmem:[%s148_s7 + $0x8] sm:$0xf] %v174_v2  ;;  %v184_v7 = vld [vmem:[%s995_s6 + $0x38] sm:$0xf]  ;;  %v186_v8 = vld [vmem:[%s995_s6 + $0x40] sm:$0xf] }
  0x19   : > { %177 = vst [vmem:[%s148_s7 + $0xc] sm:$0xf] %v176_v3  ;;  %v188_v9 = vld [vmem:[%s995_s6 + $0x48] sm:$0xf]  ;;  %v190_v10 = vld [vmem:[%s995_s6 + $0x50] sm:$0xf] }
  0x1a   : > { %179 = vst [vmem:[%s148_s7 + $0x10] sm:$0xf] %v178_v4  ;;  %v192_v11 = vld [vmem:[%s995_s6 + $0x58] sm:$0xf]  ;;  %v194_v12 = vld [vmem:[%s995_s6 + $0x60] sm:$0xf] }
  0x1b   : > { %181 = vst [vmem:[%s148_s7 + $0x14] sm:$0xf] %v180_v5  ;;  %v196_v13 = vld [vmem:[%s995_s6 + $0x68] sm:$0xf]  ;;  %v198_v14 = vld [vmem:[%s995_s6 + $0x70] sm:$0xf] }
  0x1c   : > { %183 = vst [vmem:[%s148_s7 + $0x18] sm:$0xf] %v182_v6  ;;  %v200_v15 = vld [vmem:[%s995_s6 + $0x78] sm:$0xf] }
  0x1d   : > { %185 = vst [vmem:[%s148_s7 + $0x1c] sm:$0xf] %v184_v7 }
  0x1e   : > { %187 = vst [vmem:[%s148_s7 + $0x20] sm:$0xf] %v186_v8 }
  0x1f   : > { %189 = vst [vmem:[%s148_s7 + $0x24] sm:$0xf] %v188_v9 }
  0x20   : > { %191 = vst [vmem:[%s148_s7 + $0x28] sm:$0xf] %v190_v10 }
  0x21   : > { %193 = vst [vmem:[%s148_s7 + $0x2c] sm:$0xf] %v192_v11 }
  0x22   : > { %195 = vst [vmem:[%s148_s7 + $0x30] sm:$0xf] %v194_v12 }
  0x23   : > { %197 = vst [vmem:[%s148_s7 + $0x34] sm:$0xf] %v196_v13 }
  0x24   : > { %199 = vst [vmem:[%s148_s7 + $0x38] sm:$0xf] %v198_v14 }
  0x25   : > { %201 = vst [vmem:[%s148_s7 + $0x3c] sm:$0xf] %v200_v15 }
  0x26 PF: > { %p685_p7 = scmp.ge.s32.totalorder %s912_s18, 1  ;;  %p256_p8 = scmp.lt.s32.totalorder %s912_s18, 5 }
  0x28   : > { %p257_p9 = pnand %p685_p7, %p256_p8 }
  0x29   : > { %s263_s8 = sand.u32 (!%p257_p9), 1, %s888_s12   ;;  %s687_s9 = sshll.u32 (!%p257_p9), %s900_s15, 4 }
  0x2a   : > { %260 = sbr.rel (%p257_p9) target bundleno = 285 (0x11d), region = 69  ;;  %s686_s10 = sshll.u32 (!%p257_p9), %s263_s8, 6 }
  0x2b   : > { %p288_p10 = scmp.lt.s32.totalorder (!%p257_p9), %s687_s9, 31  ;;  %s1022_s24 = scalar_lea.vmem (!%p257_p9), [#allocation3], %s686_s10 }
  0x2c   : > { %p689_p11 = scmp.ne.s32.totalorder (!%p257_p9), %s896_s14, 0 }
  0x2f   : > { %s1105_s9 = smov (!%p288_p10, %s687_s9), 31  ;;  %296 = sbr.rel (%p689_p11) target bundleno = 69 (0x45), region = 77 }
  0x30   : > { %s688_s11 = sshll.u32 %s1105_s9, 3 }
  0x31   : > { %s1020_s23 = scalar_lea.vmem %s1091_s3, %s688_s11 }
  0x34   : > { %v914_v16 = vmov 0.0  }
  0x35   : > { %297 = vst [vmem:[#allocation2 + $0x30] sm:$0xff] %v914_v16 }
  0x36   : > { %298 = vst [vmem:[#allocation2] sm:$0xff] %v914_v16 }
  0x37   : > { %299 = vst [vmem:[#allocation2 + $0x58] sm:$0xff] %v914_v16 }
  0x38   : > { %300 = vst [vmem:[#allocation2 + $0x18] sm:$0xff] %v914_v16 }
  0x39   : > { %301 = vst [vmem:[#allocation2 + $0x50] sm:$0xff] %v914_v16 }
  0x3a   : > { %302 = vst [vmem:[#allocation2 + $0x68] sm:$0xff] %v914_v16 }
  0x3b   : > { %303 = vst [vmem:[#allocation2 + $0x8] sm:$0xff] %v914_v16 }
  0x3c   : > { %304 = vst [vmem:[#allocation2 + $0x48] sm:$0xff] %v914_v16 }
  0x3d   : > { %305 = vst [vmem:[#allocation2 + $0x40] sm:$0xff] %v914_v16 }
  0x3e   : > { %306 = vst [vmem:[#allocation2 + $0x20] sm:$0xff] %v914_v16 }
  0x3f   : > { %307 = vst [vmem:[#allocation2 + $0x10] sm:$0xff] %v914_v16 }
  0x40   : > { %308 = vst [vmem:[#allocation2 + $0x38] sm:$0xff] %v914_v16 }
  0x41   : > { %309 = vst [vmem:[#allocation2 + $0x60] sm:$0xff] %v914_v16 }
  0x42   : > { %310 = vst [vmem:[#allocation2 + $0x70] sm:$0xff] %v914_v16 }
  0x43   : > { %311 = vst [vmem:[#allocation2 + $0x78] sm:$0xff] %v914_v16 }
  0x44   : > { %312 = vst [vmem:[#allocation2 + $0x28] sm:$0xff] %v914_v16 }
  0x45 PF: > { %s690_s12 = sshll.u32 %s896_s14, 7  ;;  %v768_v25 = vld [vmem:[%s1022_s24] sm:$0xff]  ;;  %v770_v26 = vld [vmem:[%s1022_s24 + $0x10] sm:$0xff]  ;;  %v769_v29 = vld [vmem:[%s1022_s24 + $0x8] sm:$0xff]  ;;  %p756_p12 = scmp.ne.s32.totalorder %s896_s14, 1 }
  0x46   : > { %s314_s15 = sshra.s32 %s690_s12, 3  ;;  %v772_v27 = vld [vmem:[%s1022_s24 + $0x20] sm:$0xff]  ;;  %v774_v28 = vld [vmem:[%s1022_s24 + $0x30] sm:$0xff]  ;;  %v771_v30 = vld [vmem:[%s1022_s24 + $0x18] sm:$0xff] }
  0x47   : > { %s691_s26 = sshll.u32 %s314_s15, 2  ;;  %v773_v31 = vld [vmem:[%s1022_s24 + $0x28] sm:$0xff]  ;;  %v775_v32 = vld [vmem:[%s1022_s24 + $0x38] sm:$0xff]  ;;  %v334_v33 = vld [vmem:[#allocation2 + $0x30] sm:$0xff] }
  0x48   : > { %s1029_s29 = scalar_lea.vmem %s1089_s1, %s691_s26  ;;  %v338_v34 = vld [vmem:[#allocation2 + $0x50] sm:$0xff]  ;;  %v342_v39 = vld [vmem:[#allocation2 + $0x40] sm:$0xff]  ;;  %v339_v42 = vld [vmem:[#allocation2 + $0x68] sm:$0xff] }
  0x49   : > { %v767_v17 = vld [vmem:[%s1029_s29 + $0x38] sm:$0xff]  ;;  %v766_v18 = vld [vmem:[%s1029_s29 + $0x30] sm:$0xff]  ;;  %v765_v19 = vld [vmem:[%s1029_s29 + $0x28] sm:$0xff] }
  0x4a   : > { %462 = vmatpush.bf16.msra.mxu0 %v767_v17  ;;  %776 = vmatpush.bf16.msra.mxu1 %v767_v17  ;;  %v764_v20 = vld [vmem:[%s1029_s29 + $0x20] sm:$0xff]  ;;  %v763_v21 = vld [vmem:[%s1029_s29 + $0x18] sm:$0xff]  ;;  %v762_v22 = vld [vmem:[%s1029_s29 + $0x10] sm:$0xff] }
  0x4b   : > { %777 = vmatpush.bf16.msra.mxu2 %v767_v17  ;;  %778 = vmatpush.bf16.msra.mxu3 %v767_v17  ;;  %v761_v23 = vld [vmem:[%s1029_s29 + $0x8] sm:$0xff]  ;;  %v760_v24 = vld [vmem:[%s1029_s29] sm:$0xff]  ;;  %v347_v52 = vld [vmem:[#allocation2 + $0x70] sm:$0xff] }
  0x4c   : > { %v346_v40 = vld [vmem:[#allocation2 + $0x60] sm:$0xff]  ;;  %v336_v53 = vld [vmem:[#allocation2 + $0x58] sm:$0xff]  ;;  %v340_v54 = vld [vmem:[#allocation2 + $0x8] sm:$0xff] }
  0x4d   : > { %v335_v41 = vld [vmem:[#allocation2] sm:$0xff]  ;;  %v344_v63 = vld [vmem:[#allocation2 + $0x10] sm:$0xff]  ;;  %v348_v0 = vld [vmem:[#allocation2 + $0x78] sm:$0xff] }
  0x4e   : > { %463 = vmatpush.bf16.msra.mxu0 %v766_v18  ;;  %779 = vmatpush.bf16.msra.mxu1 %v766_v18  ;;  %v343_v51 = vld [vmem:[#allocation2 + $0x20] sm:$0xff]  ;;  %v337_v1 = vld [vmem:[#allocation2 + $0x18] sm:$0xff]  ;;  %v341_v2 = vld [vmem:[#allocation2 + $0x48] sm:$0xff] }
  0x4f   : > { %780 = vmatpush.bf16.msra.mxu2 %v766_v18  ;;  %781 = vmatpush.bf16.msra.mxu3 %v766_v18  ;;  %v345_v11 = vld [vmem:[#allocation2 + $0x38] sm:$0xff]  ;;  %v349_v12 = vld [vmem:[#allocation2 + $0x28] sm:$0xff] }
  0x52   : > { %464 = vmatpush.bf16.msra.mxu0 %v765_v19  ;;  %782 = vmatpush.bf16.msra.mxu1 %v765_v19 }
  0x53   : > { %783 = vmatpush.bf16.msra.mxu2 %v765_v19  ;;  %784 = vmatpush.bf16.msra.mxu3 %v765_v19 }
  0x56   : > { %465 = vmatpush.bf16.msra.mxu0 %v764_v20  ;;  %785 = vmatpush.bf16.msra.mxu1 %v764_v20 }
  0x57   : > { %786 = vmatpush.bf16.msra.mxu2 %v764_v20  ;;  %787 = vmatpush.bf16.msra.mxu3 %v764_v20 }
  0x5a   : > { %466 = vmatpush.bf16.msra.mxu0 %v763_v21  ;;  %788 = vmatpush.bf16.msra.mxu1 %v763_v21 }
  0x5b   : > { %789 = vmatpush.bf16.msra.mxu2 %v763_v21  ;;  %790 = vmatpush.bf16.msra.mxu3 %v763_v21 }
  0x5e   : > { %467 = vmatpush.bf16.msra.mxu0 %v762_v22  ;;  %791 = vmatpush.bf16.msra.mxu1 %v762_v22 }
  0x5f   : > { %792 = vmatpush.bf16.msra.mxu2 %v762_v22  ;;  %793 = vmatpush.bf16.msra.mxu3 %v762_v22 }
  0x62   : > { %468 = vmatpush.bf16.msra.mxu0 %v761_v23  ;;  %794 = vmatpush.bf16.msra.mxu1 %v761_v23 }
  0x63   : > { %795 = vmatpush.bf16.msra.mxu2 %v761_v23  ;;  %796 = vmatpush.bf16.msra.mxu3 %v761_v23 }
  0x66   : > { %469 = vmatpush.bf16.msra.mxu0 %v760_v24  ;;  %797 = vmatpush.bf16.msra.mxu1 %v760_v24 }
  0x67   : > { %798 = vmatpush.bf16.msra.mxu2 %v760_v24  ;;  %799 = vmatpush.bf16.msra.mxu3 %v760_v24 }
  0x69   : > { %470 = vmatmul.bf16.vlgmr.msra.gmra.mxu0 %v768_v25  ;;  %480 = vmatmul.bf16.vlgmr.msra.gmra.mxu1 %v770_v26 }
  0x6a   : > { %490 = vmatmul.bf16.vlgmr.msra.gmra.mxu2 %v772_v27  ;;  %500 = vmatmul.bf16.vlgmr.msra.gmra.mxu3 %v774_v28 }
  0x79   : > { %475 = vmatmul.bf16.gmra.mxu0 %v769_v29  ;;  %485 = vmatmul.bf16.gmra.mxu1 %v771_v30 }
  0x7a   : > { %495 = vmatmul.bf16.gmra.mxu2 %v773_v31  ;;  %505 = vmatmul.bf16.gmra.mxu3 %v775_v32 }
  0xe6   : > { %v471_v35 = vpop.f32.mrf.mxu0  ;;  %v481_v36 = vpop.f32.mrf.mxu1 }
  0xe7   : > { %v511_v37 = vadd.f32 %v471_v35, %v334_v33  ;;  %v515_v38 = vadd.f32 %v481_v36, %v338_v34 }
  0xe9   : > { %527 = vst [vmem:[#allocation2 + $0x30] sm:$0xff] %v511_v37 }
  0xea   : > { %531 = vst [vmem:[#allocation2 + $0x50] sm:$0xff] %v515_v38 }
  0xed   : > { %v491_v43 = vpop.f32.mrf.mxu2  ;;  %v501_v44 = vpop.f32.mrf.mxu3 }
  0xee   : > { %v519_v45 = vadd.f32 %v491_v43, %v342_v39  ;;  %v523_v46 = vadd.f32 %v501_v44, %v346_v40  ;;  %v473_v47 = vpop.f32.mrf.mxu0  ;;  %v483_v48 = vpop.f32.mrf.mxu1 }
  0xef   : > { %v512_v49 = vadd.f32 %v473_v47, %v335_v41  ;;  %v516_v50 = vadd.f32 %v483_v48, %v339_v42 }
  0xf0   : > { %535 = vst [vmem:[#allocation2 + $0x40] sm:$0xff] %v519_v45 }
  0xf1   : > { %539 = vst [vmem:[#allocation2 + $0x60] sm:$0xff] %v523_v46 }
  0xf2   : > { %528 = vst [vmem:[#allocation2] sm:$0xff] %v512_v49 }
  0xf3   : > { %532 = vst [vmem:[#allocation2 + $0x68] sm:$0xff] %v516_v50 }
  0xf5   : > { %v493_v55 = vpop.f32.mrf.mxu2  ;;  %v503_v56 = vpop.f32.mrf.mxu3 }
  0xf6   : > { %v520_v57 = vadd.f32 %v493_v55, %v343_v51  ;;  %v524_v58 = vadd.f32 %v503_v56, %v347_v52  ;;  %v476_v59 = vpop.f32.mrf.mxu0  ;;  %v486_v60 = vpop.f32.mrf.mxu1 }
  0xf7   : > { %v513_v61 = vadd.f32 %v476_v59, %v336_v53  ;;  %v517_v62 = vadd.f32 %v486_v60, %v340_v54 }
  0xf8   : > { %536 = vst [vmem:[#allocation2 + $0x20] sm:$0xff] %v520_v57 }
  0xf9   : > { %540 = vst [vmem:[#allocation2 + $0x70] sm:$0xff] %v524_v58 }
  0xfa   : > { %529 = vst [vmem:[#allocation2 + $0x58] sm:$0xff] %v513_v61 }
  0xfb   : > { %533 = vst [vmem:[#allocation2 + $0x8] sm:$0xff] %v517_v62 }
  0xfd   : > { %v496_v3 = vpop.f32.mrf.mxu2  ;;  %v506_v4 = vpop.f32.mrf.mxu3 }
  0xfe   : > { %v521_v5 = vadd.f32 %v496_v3, %v344_v63  ;;  %v525_v6 = vadd.f32 %v506_v4, %v348_v0  ;;  %v478_v7 = vpop.f32.mrf.mxu0  ;;  %v488_v8 = vpop.f32.mrf.mxu1 }
  0xff   : > { %v514_v9 = vadd.f32 %v478_v7, %v337_v1  ;;  %v518_v10 = vadd.f32 %v488_v8, %v341_v2 }
 0x100   : > { %537 = vst [vmem:[#allocation2 + $0x10] sm:$0xff] %v521_v5 }
 0x101   : > { %541 = vst [vmem:[#allocation2 + $0x78] sm:$0xff] %v525_v6 }
 0x102   : > { %530 = vst [vmem:[#allocation2 + $0x18] sm:$0xff] %v514_v9 }
 0x103   : > { %534 = vst [vmem:[#allocation2 + $0x48] sm:$0xff] %v518_v10 }
 0x105   : > { %v498_v13 = vpop.f32.mrf.mxu2  ;;  %v508_v14 = vpop.f32.mrf.mxu3  ;;  %546 = sbr.rel (%p756_p12) target bundleno = 285 (0x11d), region = 81 }
 0x106   : > { %v522_v15 = vadd.f32 %v498_v13, %v345_v11  ;;  %v526_v16 = vadd.f32 %v508_v14, %v349_v12 }
 0x108   : > { %538 = vst [vmem:[#allocation2 + $0x38] sm:$0xff] %v522_v15 }
 0x109   : > { %542 = vst [vmem:[#allocation2 + $0x28] sm:$0xff] %v526_v16 }
 0x10a   : > { %v547_v17 = vld [vmem:[#allocation2 + $0x30] sm:$0xff]  ;;  %v857_v18 = vld [vmem:[%s1090_s2] ss:$0 sm:$0xff]  ;;  %v549_v20 = vld [vmem:[#allocation2 + $0x58] sm:$0xff] }
 0x10b   : > { %v548_v19 = vld [vmem:[#allocation2] sm:$0xff]  ;;  %v550_v21 = vld [vmem:[#allocation2 + $0x18] sm:$0xff]  ;;  %v567_v22 = vadd.f32 %v857_v18, %v547_v17  ;;  %v569_v24 = vadd.f32 %v857_v18, %v549_v20  ;;  %v551_v25 = vld [vmem:[#allocation2 + $0x50] sm:$0xff] }
 0x10c   : > { %v568_v23 = vadd.f32 %v857_v18, %v548_v19  ;;  %v552_v26 = vld [vmem:[#allocation2 + $0x68] sm:$0xff]  ;;  %v570_v27 = vadd.f32 %v857_v18, %v550_v21  ;;  %v571_v29 = vadd.f32 %v857_v18, %v551_v25  ;;  %v555_v32 = vld [vmem:[#allocation2 + $0x40] sm:$0xff]  ;;  %v557_v36 = vld [vmem:[#allocation2 + $0x10] sm:$0xff] }
 0x10d   : > { %v553_v28 = vld [vmem:[#allocation2 + $0x8] sm:$0xff]  ;;  %583 = vst [vmem:[%s1020_s23] sm:$0xff] %v567_v22  ;;  %v572_v31 = vadd.f32 %v857_v18, %v552_v26  ;;  %v556_v34 = vld [vmem:[#allocation2 + $0x20] sm:$0xff]  ;;  %v575_v37 = vadd.f32 %v857_v18, %v555_v32  ;;  %v577_v41 = vadd.f32 %v857_v18, %v557_v36  ;;  %v560_v42 = vld [vmem:[#allocation2 + $0x70] sm:$0xff] }
 0x10e   : > { %v554_v30 = vld [vmem:[#allocation2 + $0x48] sm:$0xff]  ;;  %584 = vst [vmem:[%s1020_s23 + $0x8] sm:$0xff] %v568_v23  ;;  %v573_v33 = vadd.f32 %v857_v18, %v553_v28  ;;  %v576_v39 = vadd.f32 %v857_v18, %v556_v34  ;;  %v559_v40 = vld [vmem:[#allocation2 + $0x60] sm:$0xff]  ;;  %v561_v44 = vld [vmem:[#allocation2 + $0x78] sm:$0xff]  ;;  %v580_v47 = vadd.f32 %v857_v18, %v560_v42 }
 0x10f   : > { %585 = vst [vmem:[%s1020_s23 + $0x10] sm:$0xff] %v569_v24  ;;  %v574_v35 = vadd.f32 %v857_v18, %v554_v30  ;;  %v558_v38 = vld [vmem:[#allocation2 + $0x38] sm:$0xff]  ;;  %v579_v45 = vadd.f32 %v857_v18, %v559_v40  ;;  %v581_v48 = vadd.f32 %v857_v18, %v561_v44 }
 0x110   : > { %586 = vst [vmem:[%s1020_s23 + $0x18] sm:$0xff] %v570_v27  ;;  %v578_v43 = vadd.f32 %v857_v18, %v558_v38  ;;  %v562_v46 = vld [vmem:[#allocation2 + $0x28] sm:$0xff] }
 0x111   : > { %587 = vst [vmem:[%s1020_s23 + $0x20] sm:$0xff] %v571_v29  ;;  %v582_v49 = vadd.f32 %v857_v18, %v562_v46 }
 0x112   : > { %588 = vst [vmem:[%s1020_s23 + $0x28] sm:$0xff] %v572_v31 }
 0x113   : > { %589 = vst [vmem:[%s1020_s23 + $0x30] sm:$0xff] %v573_v33 }
 0x114   : > { %590 = vst [vmem:[%s1020_s23 + $0x38] sm:$0xff] %v574_v35 }
 0x115   : > { %591 = vst [vmem:[%s1020_s23 + $0x40] sm:$0xff] %v575_v37 }
 0x116   : > { %592 = vst [vmem:[%s1020_s23 + $0x48] sm:$0xff] %v576_v39 }
 0x117   : > { %593 = vst [vmem:[%s1020_s23 + $0x50] sm:$0xff] %v577_v41 }
 0x118   : > { %594 = vst [vmem:[%s1020_s23 + $0x58] sm:$0xff] %v578_v43 }
 0x119   : > { %595 = vst [vmem:[%s1020_s23 + $0x60] sm:$0xff] %v579_v45 }
 0x11a   : > { %596 = vst [vmem:[%s1020_s23 + $0x68] sm:$0xff] %v580_v47 }
 0x11b   : > { %597 = vst [vmem:[%s1020_s23 + $0x70] sm:$0xff] %v581_v48 }
 0x11c   : > { %598 = vst [vmem:[%s1020_s23 + $0x78] sm:$0xff] %v582_v49 }
 0x11d PF: > { %s13_s18 = sadd.s32 1, %s912_s18   ;;  %s1092_s12 = smov %s892_s13 }
 0x11e   : > { %p10_p13 = scmp.ge.s32.totalorder %s13_s18, 6   ;;  %s1093_s13 = smov %s986_s25 }
 0x11f   : > { %s1094_s14 = smov %s904_s16  ;;  %s1095_s15 = smov %s908_s17 }
 0x120   : > { %s1096_s16 = smov %s1099_s19  ;;  %s1097_s17 = smov %s1103_s20 }
 0x121   :  { %12 = sbr.rel (!%p10_p13) target bundleno = 4 (0x4), region = 117 }

// kernel: gcn_diff_forward.4
= control target key start
LH: loop header
LB: loop body
LE: loop exit
PB: predicated region body
PF: predicated region fallthrough
CT: control target
= control target key end

     0   :  { %s605_s9 = smov 0   ;;  %s653_s0 = inlined_call_operand.vmem [shape: bf16[256,128], index: 0, kind: input, shape index: {}]   ;;  %s654_s1 = inlined_call_operand.vmem [shape: bf16[128,128], index: 1, kind: input, shape index: {}]   ;;  %s655_s2 = inlined_call_operand.vmem [shape: bf16[256,128], index: 2, kind: output, shape index: {}]  }
   0x1 LB: > { %s412_s10 = sadd.s32 4294967295, %s588_s9   ;;  %p416_p0 = scmp.ge.s32.totalorder %s588_s9, 1  ;;  %s588_s9 = sphi %s605_s9, %s12_s9  }
   0x2   : > { %p113_p1 = scmp.lt.s32.totalorder %s588_s9, 3 }
   0x4   : > { %p114_p2 = pnand %p416_p0, %p113_p1 }
   0x5   : > { %s417_s19 = sshll.u32 (!%p114_p2), %s412_s10, 4 }
   0x6   : > { %117 = sbr.rel (%p114_p2) target bundleno = 204 (0xcc), region = 28  ;;  %p136_p3 = scmp.lt.s32.totalorder (!%p114_p2), %s417_s19, 31 }
   0xb   : > { %v502_v0 = vld [vmem:[%s654_s1 + $0x38] sm:$0xff]  ;;  %v501_v1 = vld [vmem:[%s654_s1 + $0x30] sm:$0xff]  ;;  %v500_v2 = vld [vmem:[%s654_s1 + $0x28] sm:$0xff]  ;;  %s657_s19 = smov (!%p136_p3, %s417_s19), 31 }
   0xc   : > { %275 = vmatpush.bf16.msra.mxu0 %v502_v0  ;;  %550 = vmatpush.bf16.msra.mxu1 %v502_v0  ;;  %v499_v3 = vld [vmem:[%s654_s1 + $0x20] sm:$0xff]  ;;  %v498_v4 = vld [vmem:[%s654_s1 + $0x18] sm:$0xff]  ;;  %v497_v5 = vld [vmem:[%s654_s1 + $0x10] sm:$0xff]  ;;  %s418_s26 = sshll.u32 %s657_s19, 2 }
   0xd   : > { %551 = vmatpush.bf16.msra.mxu2 %v502_v0  ;;  %552 = vmatpush.bf16.msra.mxu3 %v502_v0  ;;  %v496_v6 = vld [vmem:[%s654_s1 + $0x8] sm:$0xff]  ;;  %v495_v7 = vld [vmem:[%s654_s1] sm:$0xff]  ;;  %s139_s3 = scalar_lea.vmem %s653_s0, %s418_s26  ;;  %s145_s6 = scalar_lea.vmem %s655_s2, %s418_s26 }
   0xe   : > { %v487_v8 = vld [vmem:[%s139_s3] sm:$0xff]  ;;  %v489_v9 = vld [vmem:[%s139_s3 + $0x10] sm:$0xff]  ;;  %v488_v12 = vld [vmem:[%s139_s3 + $0x8] sm:$0xff] }
   0xf   : > { %v491_v10 = vld [vmem:[%s139_s3 + $0x20] sm:$0xff]  ;;  %v493_v11 = vld [vmem:[%s139_s3 + $0x30] sm:$0xff]  ;;  %v490_v13 = vld [vmem:[%s139_s3 + $0x18] sm:$0xff] }
  0x10   : > { %276 = vmatpush.bf16.msra.mxu0 %v501_v1  ;;  %553 = vmatpush.bf16.msra.mxu1 %v501_v1  ;;  %v492_v14 = vld [vmem:[%s139_s3 + $0x28] sm:$0xff]  ;;  %v494_v15 = vld [vmem:[%s139_s3 + $0x38] sm:$0xff] }
  0x11   : > { %554 = vmatpush.bf16.msra.mxu2 %v501_v1  ;;  %555 = vmatpush.bf16.msra.mxu3 %v501_v1 }
  0x14   : > { %277 = vmatpush.bf16.msra.mxu0 %v500_v2  ;;  %556 = vmatpush.bf16.msra.mxu1 %v500_v2 }
  0x15   : > { %557 = vmatpush.bf16.msra.mxu2 %v500_v2  ;;  %558 = vmatpush.bf16.msra.mxu3 %v500_v2 }
  0x18   : > { %278 = vmatpush.bf16.msra.mxu0 %v499_v3  ;;  %559 = vmatpush.bf16.msra.mxu1 %v499_v3 }
  0x19   : > { %560 = vmatpush.bf16.msra.mxu2 %v499_v3  ;;  %561 = vmatpush.bf16.msra.mxu3 %v499_v3 }
  0x1c   : > { %279 = vmatpush.bf16.msra.mxu0 %v498_v4  ;;  %562 = vmatpush.bf16.msra.mxu1 %v498_v4 }
  0x1d   : > { %563 = vmatpush.bf16.msra.mxu2 %v498_v4  ;;  %564 = vmatpush.bf16.msra.mxu3 %v498_v4 }
  0x20   : > { %280 = vmatpush.bf16.msra.mxu0 %v497_v5  ;;  %565 = vmatpush.bf16.msra.mxu1 %v497_v5 }
  0x21   : > { %566 = vmatpush.bf16.msra.mxu2 %v497_v5  ;;  %567 = vmatpush.bf16.msra.mxu3 %v497_v5 }
  0x24   : > { %281 = vmatpush.bf16.msra.mxu0 %v496_v6  ;;  %568 = vmatpush.bf16.msra.mxu1 %v496_v6 }
  0x25   : > { %569 = vmatpush.bf16.msra.mxu2 %v496_v6  ;;  %570 = vmatpush.bf16.msra.mxu3 %v496_v6 }
  0x28   : > { %282 = vmatpush.bf16.msra.mxu0 %v495_v7  ;;  %571 = vmatpush.bf16.msra.mxu1 %v495_v7 }
  0x29   : > { %572 = vmatpush.bf16.msra.mxu2 %v495_v7  ;;  %573 = vmatpush.bf16.msra.mxu3 %v495_v7 }
  0x2b   : > { %283 = vmatmul.bf16.vlgmr.msra.gmra.mxu0 %v487_v8  ;;  %293 = vmatmul.bf16.vlgmr.msra.gmra.mxu1 %v489_v9 }
  0x2c   : > { %303 = vmatmul.bf16.vlgmr.msra.gmra.mxu2 %v491_v10  ;;  %313 = vmatmul.bf16.vlgmr.msra.gmra.mxu3 %v493_v11 }
  0x3b   : > { %288 = vmatmul.bf16.gmra.mxu0 %v488_v12  ;;  %298 = vmatmul.bf16.gmra.mxu1 %v490_v13 }
  0x3c   : > { %308 = vmatmul.bf16.gmra.mxu2 %v492_v14  ;;  %318 = vmatmul.bf16.gmra.mxu3 %v494_v15 }
  0xa8   : > { %v284_v16 = vpop.f32.mrf.mxu0  ;;  %v294_v17 = vpop.f32.mrf.mxu1 }
  0xaf   : > { %v304_v18 = vpop.f32.mrf.mxu2  ;;  %v314_v19 = vpop.f32.mrf.mxu3 }
  0xb0   : > { %v286_v20 = vpop.f32.mrf.mxu0  ;;  %v296_v21 = vpop.f32.mrf.mxu1 }
  0xb1   : > { %v506_v22 = vpack.c.bf16 %v286_v20, %v284_v16  ;;  %v516_v23 = vpack.c.bf16 %v296_v21, %v294_v17 }
  0xb3   : > { %507 = vst [vmem:[%s145_s6] sm:$0xff] %v506_v22  }
  0xb4   : > { %544 = vst [vmem:[%s145_s6 + $0x10] sm:$0xff] %v516_v23  }
  0xb7   : > { %v306_v24 = vpop.f32.mrf.mxu2  ;;  %v316_v25 = vpop.f32.mrf.mxu3 }
  0xb8   : > { %v526_v26 = vpack.c.bf16 %v306_v24, %v304_v18  ;;  %v536_v27 = vpack.c.bf16 %v316_v25, %v314_v19  ;;  %v289_v28 = vpop.f32.mrf.mxu0  ;;  %v299_v29 = vpop.f32.mrf.mxu1 }
  0xba   : > { %546 = vst [vmem:[%s145_s6 + $0x20] sm:$0xff] %v526_v26  }
  0xbb   : > { %548 = vst [vmem:[%s145_s6 + $0x30] sm:$0xff] %v536_v27  }
  0xbf   : > { %v309_v30 = vpop.f32.mrf.mxu2  ;;  %v319_v31 = vpop.f32.mrf.mxu3 }
  0xc0   : > { %v291_v32 = vpop.f32.mrf.mxu0  ;;  %v301_v33 = vpop.f32.mrf.mxu1 }
  0xc1   : > { %v511_v34 = vpack.c.bf16 %v291_v32, %v289_v28  ;;  %v521_v35 = vpack.c.bf16 %v301_v33, %v299_v29 }
  0xc3   : > { %543 = vst [vmem:[%s145_s6 + $0x8] sm:$0xff] %v511_v34  }
  0xc4   : > { %545 = vst [vmem:[%s145_s6 + $0x18] sm:$0xff] %v521_v35  }
  0xc7   : > { %v311_v36 = vpop.f32.mrf.mxu2  ;;  %v321_v37 = vpop.f32.mrf.mxu3 }
  0xc8   : > { %v531_v38 = vpack.c.bf16 %v311_v36, %v309_v30  ;;  %v541_v39 = vpack.c.bf16 %v321_v37, %v319_v31 }
  0xca   : > { %547 = vst [vmem:[%s145_s6 + $0x28] sm:$0xff] %v531_v38  }
  0xcb   : > { %549 = vst [vmem:[%s145_s6 + $0x38] sm:$0xff] %v541_v39  }
  0xcc PF: > { %s12_s9 = sadd.s32 1, %s588_s9  }
  0xcd   : > { %p9_p4 = scmp.ge.s32.totalorder %s12_s9, 4  }
  0xcf   :  { %11 = sbr.rel (!%p9_p4) target bundleno = 1 (0x1), region = 58 }

// kernel: gcn_diff_forward.5
= control target key start
LH: loop header
LB: loop body
LE: loop exit
PB: predicated region body
PF: predicated region fallthrough
CT: control target
= control target key end

     0   :  { %s1014_s12 = smov 0   ;;  %s1016_s13 = smov 0   ;;  %s1159_s0 = inlined_call_operand.vmem [shape: bf16[256,256], index: 0, kind: input, shape index: {}]   ;;  %s1160_s1 = inlined_call_operand.vmem [shape: bf16[256,128], index: 1, kind: input, shape index: {}]   ;;  %s1161_s2 = inlined_call_operand.vmem [shape: f32[1,128], index: 2, kind: input, shape index: {}]   ;;  %s1162_s3 = inlined_call_operand.vmem [shape: bf16[256,128], index: 3, kind: output, shape index: {}]  }
   0x1   :  { %s1018_s14 = smov 0   ;;  %s1020_s15 = smov 0  }
   0x2   :  { %s1022_s16 = smov 0   ;;  %s1024_s17 = smov 0  }
   0x3   :  { %s1026_s18 = smov 0  }
   0x4 LB: > { %s22_s19 = sadd.s32 1, %s983_s16  ;;  %s25_s20 = sadd.s32 1, %s987_s17  ;;  %s991_s18 = sphi %s1026_s18, %s13_s18   ;;  %s987_s17 = sphi %s1024_s17, %s1168_s17   ;;  %s983_s16 = sphi %s1022_s16, %s1167_s16   ;;  %s979_s15 = sphi %s1020_s15, %s1166_s15   ;;  %s975_s14 = sphi %s1018_s14, %s1165_s14   ;;  %s971_s13 = sphi %s1016_s13, %s1164_s13   ;;  %s967_s12 = sphi %s1014_s12, %s1163_s12  }
   0x5   : > { %p23_p0 = scmp.ge.s32.totalorder %s22_s19, 2  ;;  %p41_p1 = scmp.ne.s32.totalorder %s971_s13, %s967_s12 }
   0x6   : > { %p42_p2 = scmp.eq.s32.totalorder %s991_s18, 0  ;;  %s34_s24 = sadd.s32 1, %s971_s13 }
   0x7   : > { %s1170_s19 = smov (%p23_p0, %s22_s19), 0  ;;  %s1172_s20 = smov (!%p23_p0, %s25_s20), %s987_s17 }
   0x8   : > { %p43_p3 = por %p42_p2, %p41_p1  ;;  %p27_p4 = scmp.ge.s32.totalorder %s1172_s20, 2 }
   0x9   : > { %s30_s21 = ssub.s32 %s983_s16, %s1170_s19  ;;  %p712_p6 = scmp.ge.s32.totalorder %s991_s18, 4 }
   0xa   : > { %s1174_s20 = smov (%p27_p4, %s1172_s20), 0 }
   0xb   : > { %s29_s22 = ssub.s32 %s987_s17, %s1174_s20  ;;  %141 = sbr.rel (%p712_p6) target bundleno = 38 (0x26), region = 24 }
   0xc   : > { %s31_s23 = sor.u32 %s30_s21, %s29_s22 }
   0xd   : > { %p32_p5 = scmp.eq.s32.totalorder %s31_s23, 0 }
   0xf   : > { %s1065_s25 = scalar_select %p32_p5, %s971_s13, %s34_s24  }
  0x10   : > { %144 = sbr.rel (!%p43_p3) target bundleno = 38 (0x26), region = 28  ;;  %s146_s26 = sand.u32 (%p43_p3), 1, %s971_s13  }
  0x11   : > { %s791_s27 = sshll.u32 (%p43_p3), %s987_s17, 5  ;;  %s713_s28 = sshll.u32 (%p43_p3), %s146_s26, 6 }
  0x12   : > { %s151_s29 = sadd.s32 (%p43_p3), %s983_s16, %s791_s27  ;;  %s148_s7 = scalar_lea.vmem (%p43_p3), [#allocation3], %s713_s28 }
  0x13   : > { %s716_s30 = sshll.u32 (%p43_p3), %s151_s29, 2 }
  0x14   : > { %s1074_s6 = scalar_lea.vmem (%p43_p3), %s1159_s0, %s716_s30 }
  0x15   : > { %v170_v0 = vld [vmem:[%s1074_s6] sm:$0xf]  ;;  %v172_v1 = vld [vmem:[%s1074_s6 + $0x8] sm:$0xf]  ;;  %v174_v2 = vld [vmem:[%s1074_s6 + $0x10] sm:$0xf] }
  0x16   : > { %171 = vst [vmem:[%s148_s7] sm:$0xf] %v170_v0  ;;  %v176_v3 = vld [vmem:[%s1074_s6 + $0x18] sm:$0xf]  ;;  %v178_v4 = vld [vmem:[%s1074_s6 + $0x20] sm:$0xf] }
  0x17   : > { %173 = vst [vmem:[%s148_s7 + $0x4] sm:$0xf] %v172_v1  ;;  %v180_v5 = vld [vmem:[%s1074_s6 + $0x28] sm:$0xf]  ;;  %v182_v6 = vld [vmem:[%s1074_s6 + $0x30] sm:$0xf] }
  0x18   : > { %175 = vst [vmem:[%s148_s7 + $0x8] sm:$0xf] %v174_v2  ;;  %v184_v7 = vld [vmem:[%s1074_s6 + $0x38] sm:$0xf]  ;;  %v186_v8 = vld [vmem:[%s1074_s6 + $0x40] sm:$0xf] }
  0x19   : > { %177 = vst [vmem:[%s148_s7 + $0xc] sm:$0xf] %v176_v3  ;;  %v188_v9 = vld [vmem:[%s1074_s6 + $0x48] sm:$0xf]  ;;  %v190_v10 = vld [vmem:[%s1074_s6 + $0x50] sm:$0xf] }
  0x1a   : > { %179 = vst [vmem:[%s148_s7 + $0x10] sm:$0xf] %v178_v4  ;;  %v192_v11 = vld [vmem:[%s1074_s6 + $0x58] sm:$0xf]  ;;  %v194_v12 = vld [vmem:[%s1074_s6 + $0x60] sm:$0xf] }
  0x1b   : > { %181 = vst [vmem:[%s148_s7 + $0x14] sm:$0xf] %v180_v5  ;;  %v196_v13 = vld [vmem:[%s1074_s6 + $0x68] sm:$0xf]  ;;  %v198_v14 = vld [vmem:[%s1074_s6 + $0x70] sm:$0xf] }
  0x1c   : > { %183 = vst [vmem:[%s148_s7 + $0x18] sm:$0xf] %v182_v6  ;;  %v200_v15 = vld [vmem:[%s1074_s6 + $0x78] sm:$0xf] }
  0x1d   : > { %185 = vst [vmem:[%s148_s7 + $0x1c] sm:$0xf] %v184_v7 }
  0x1e   : > { %187 = vst [vmem:[%s148_s7 + $0x20] sm:$0xf] %v186_v8 }
  0x1f   : > { %189 = vst [vmem:[%s148_s7 + $0x24] sm:$0xf] %v188_v9 }
  0x20   : > { %191 = vst [vmem:[%s148_s7 + $0x28] sm:$0xf] %v190_v10 }
  0x21   : > { %193 = vst [vmem:[%s148_s7 + $0x2c] sm:$0xf] %v192_v11 }
  0x22   : > { %195 = vst [vmem:[%s148_s7 + $0x30] sm:$0xf] %v194_v12 }
  0x23   : > { %197 = vst [vmem:[%s148_s7 + $0x34] sm:$0xf] %v196_v13 }
  0x24   : > { %199 = vst [vmem:[%s148_s7 + $0x38] sm:$0xf] %v198_v14 }
  0x25   : > { %201 = vst [vmem:[%s148_s7 + $0x3c] sm:$0xf] %v200_v15 }
  0x26 PF: > { %p717_p7 = scmp.ge.s32.totalorder %s991_s18, 1  ;;  %p256_p8 = scmp.lt.s32.totalorder %s991_s18, 5 }
  0x28   : > { %p257_p9 = pnand %p717_p7, %p256_p8 }
  0x29   : > { %s263_s8 = sand.u32 (!%p257_p9), 1, %s967_s12   ;;  %s719_s9 = sshll.u32 (!%p257_p9), %s979_s15, 4 }
  0x2a   : > { %260 = sbr.rel (%p257_p9) target bundleno = 282 (0x11a), region = 69  ;;  %s718_s10 = sshll.u32 (!%p257_p9), %s263_s8, 6 }
  0x2b   : > { %p288_p10 = scmp.lt.s32.totalorder (!%p257_p9), %s719_s9, 31  ;;  %s1101_s24 = scalar_lea.vmem (!%p257_p9), [#allocation3], %s718_s10 }
  0x2c   : > { %p721_p11 = scmp.ne.s32.totalorder (!%p257_p9), %s975_s14, 0 }
  0x2f   : > { %s1176_s9 = smov (!%p288_p10, %s719_s9), 31  ;;  %296 = sbr.rel (%p721_p11) target bundleno = 69 (0x45), region = 77 }
  0x30   : > { %s720_s11 = sshll.u32 %s1176_s9, 2 }
  0x31   : > { %s1099_s23 = scalar_lea.vmem %s1162_s3, %s720_s11 }
  0x34   : > { %v993_v16 = vmov 0.0  }
  0x35   : > { %297 = vst [vmem:[#allocation2 + $0x30] sm:$0xff] %v993_v16 }
  0x36   : > { %298 = vst [vmem:[#allocation2] sm:$0xff] %v993_v16 }
  0x37   : > { %299 = vst [vmem:[#allocation2 + $0x58] sm:$0xff] %v993_v16 }
  0x38   : > { %300 = vst [vmem:[#allocation2 + $0x18] sm:$0xff] %v993_v16 }
  0x39   : > { %301 = vst [vmem:[#allocation2 + $0x50] sm:$0xff] %v993_v16 }
  0x3a   : > { %302 = vst [vmem:[#allocation2 + $0x68] sm:$0xff] %v993_v16 }
  0x3b   : > { %303 = vst [vmem:[#allocation2 + $0x8] sm:$0xff] %v993_v16 }
  0x3c   : > { %304 = vst [vmem:[#allocation2 + $0x48] sm:$0xff] %v993_v16 }
  0x3d   : > { %305 = vst [vmem:[#allocation2 + $0x40] sm:$0xff] %v993_v16 }
  0x3e   : > { %306 = vst [vmem:[#allocation2 + $0x20] sm:$0xff] %v993_v16 }
  0x3f   : > { %307 = vst [vmem:[#allocation2 + $0x10] sm:$0xff] %v993_v16 }
  0x40   : > { %308 = vst [vmem:[#allocation2 + $0x38] sm:$0xff] %v993_v16 }
  0x41   : > { %309 = vst [vmem:[#allocation2 + $0x60] sm:$0xff] %v993_v16 }
  0x42   : > { %310 = vst [vmem:[#allocation2 + $0x70] sm:$0xff] %v993_v16 }
  0x43   : > { %311 = vst [vmem:[#allocation2 + $0x78] sm:$0xff] %v993_v16 }
  0x44   : > { %312 = vst [vmem:[#allocation2 + $0x28] sm:$0xff] %v993_v16 }
  0x45 PF: > { %s722_s12 = sshll.u32 %s975_s14, 7  ;;  %v800_v25 = vld [vmem:[%s1101_s24] sm:$0xff]  ;;  %v802_v26 = vld [vmem:[%s1101_s24 + $0x10] sm:$0xff]  ;;  %v801_v29 = vld [vmem:[%s1101_s24 + $0x8] sm:$0xff]  ;;  %p788_p12 = scmp.ne.s32.totalorder %s975_s14, 1 }
  0x46   : > { %s314_s15 = sshra.s32 %s722_s12, 3  ;;  %v804_v27 = vld [vmem:[%s1101_s24 + $0x20] sm:$0xff]  ;;  %v806_v28 = vld [vmem:[%s1101_s24 + $0x30] sm:$0xff]  ;;  %v803_v30 = vld [vmem:[%s1101_s24 + $0x18] sm:$0xff] }
  0x47   : > { %s723_s26 = sshll.u32 %s314_s15, 2  ;;  %v805_v31 = vld [vmem:[%s1101_s24 + $0x28] sm:$0xff]  ;;  %v807_v32 = vld [vmem:[%s1101_s24 + $0x38] sm:$0xff]  ;;  %v334_v33 = vld [vmem:[#allocation2 + $0x30] sm:$0xff] }
  0x48   : > { %s1108_s29 = scalar_lea.vmem %s1160_s1, %s723_s26  ;;  %v338_v34 = vld [vmem:[#allocation2 + $0x50] sm:$0xff]  ;;  %v342_v39 = vld [vmem:[#allocation2 + $0x40] sm:$0xff]  ;;  %v339_v42 = vld [vmem:[#allocation2 + $0x68] sm:$0xff] }
  0x49   : > { %v799_v17 = vld [vmem:[%s1108_s29 + $0x38] sm:$0xff]  ;;  %v798_v18 = vld [vmem:[%s1108_s29 + $0x30] sm:$0xff]  ;;  %v797_v19 = vld [vmem:[%s1108_s29 + $0x28] sm:$0xff] }
  0x4a   : > { %462 = vmatpush.bf16.msra.mxu0 %v799_v17  ;;  %855 = vmatpush.bf16.msra.mxu1 %v799_v17  ;;  %v796_v20 = vld [vmem:[%s1108_s29 + $0x20] sm:$0xff]  ;;  %v795_v21 = vld [vmem:[%s1108_s29 + $0x18] sm:$0xff]  ;;  %v794_v22 = vld [vmem:[%s1108_s29 + $0x10] sm:$0xff] }
  0x4b   : > { %856 = vmatpush.bf16.msra.mxu2 %v799_v17  ;;  %857 = vmatpush.bf16.msra.mxu3 %v799_v17  ;;  %v793_v23 = vld [vmem:[%s1108_s29 + $0x8] sm:$0xff]  ;;  %v792_v24 = vld [vmem:[%s1108_s29] sm:$0xff]  ;;  %v347_v52 = vld [vmem:[#allocation2 + $0x70] sm:$0xff] }
  0x4c   : > { %v346_v40 = vld [vmem:[#allocation2 + $0x60] sm:$0xff]  ;;  %v336_v53 = vld [vmem:[#allocation2 + $0x58] sm:$0xff]  ;;  %v340_v54 = vld [vmem:[#allocation2 + $0x8] sm:$0xff] }
  0x4d   : > { %v335_v41 = vld [vmem:[#allocation2] sm:$0xff]  ;;  %v344_v63 = vld [vmem:[#allocation2 + $0x10] sm:$0xff]  ;;  %v348_v0 = vld [vmem:[#allocation2 + $0x78] sm:$0xff] }
  0x4e   : > { %463 = vmatpush.bf16.msra.mxu0 %v798_v18  ;;  %858 = vmatpush.bf16.msra.mxu1 %v798_v18  ;;  %v343_v51 = vld [vmem:[#allocation2 + $0x20] sm:$0xff]  ;;  %v337_v1 = vld [vmem:[#allocation2 + $0x18] sm:$0xff]  ;;  %v341_v2 = vld [vmem:[#allocation2 + $0x48] sm:$0xff] }
  0x4f   : > { %859 = vmatpush.bf16.msra.mxu2 %v798_v18  ;;  %860 = vmatpush.bf16.msra.mxu3 %v798_v18  ;;  %v345_v11 = vld [vmem:[#allocation2 + $0x38] sm:$0xff]  ;;  %v349_v12 = vld [vmem:[#allocation2 + $0x28] sm:$0xff] }
  0x52   : > { %464 = vmatpush.bf16.msra.mxu0 %v797_v19  ;;  %861 = vmatpush.bf16.msra.mxu1 %v797_v19 }
  0x53   : > { %862 = vmatpush.bf16.msra.mxu2 %v797_v19  ;;  %863 = vmatpush.bf16.msra.mxu3 %v797_v19 }
  0x56   : > { %465 = vmatpush.bf16.msra.mxu0 %v796_v20  ;;  %864 = vmatpush.bf16.msra.mxu1 %v796_v20 }
  0x57   : > { %865 = vmatpush.bf16.msra.mxu2 %v796_v20  ;;  %866 = vmatpush.bf16.msra.mxu3 %v796_v20 }
  0x5a   : > { %466 = vmatpush.bf16.msra.mxu0 %v795_v21  ;;  %867 = vmatpush.bf16.msra.mxu1 %v795_v21 }
  0x5b   : > { %868 = vmatpush.bf16.msra.mxu2 %v795_v21  ;;  %869 = vmatpush.bf16.msra.mxu3 %v795_v21 }
  0x5e   : > { %467 = vmatpush.bf16.msra.mxu0 %v794_v22  ;;  %870 = vmatpush.bf16.msra.mxu1 %v794_v22 }
  0x5f   : > { %871 = vmatpush.bf16.msra.mxu2 %v794_v22  ;;  %872 = vmatpush.bf16.msra.mxu3 %v794_v22 }
  0x62   : > { %468 = vmatpush.bf16.msra.mxu0 %v793_v23  ;;  %873 = vmatpush.bf16.msra.mxu1 %v793_v23 }
  0x63   : > { %874 = vmatpush.bf16.msra.mxu2 %v793_v23  ;;  %875 = vmatpush.bf16.msra.mxu3 %v793_v23 }
  0x66   : > { %469 = vmatpush.bf16.msra.mxu0 %v792_v24  ;;  %876 = vmatpush.bf16.msra.mxu1 %v792_v24 }
  0x67   : > { %877 = vmatpush.bf16.msra.mxu2 %v792_v24  ;;  %878 = vmatpush.bf16.msra.mxu3 %v792_v24 }
  0x69   : > { %470 = vmatmul.bf16.vlgmr.msra.gmra.mxu0 %v800_v25  ;;  %480 = vmatmul.bf16.vlgmr.msra.gmra.mxu1 %v802_v26 }
  0x6a   : > { %490 = vmatmul.bf16.vlgmr.msra.gmra.mxu2 %v804_v27  ;;  %500 = vmatmul.bf16.vlgmr.msra.gmra.mxu3 %v806_v28 }
  0x79   : > { %475 = vmatmul.bf16.gmra.mxu0 %v801_v29  ;;  %485 = vmatmul.bf16.gmra.mxu1 %v803_v30 }
  0x7a   : > { %495 = vmatmul.bf16.gmra.mxu2 %v805_v31  ;;  %505 = vmatmul.bf16.gmra.mxu3 %v807_v32 }
  0xe6   : > { %v471_v35 = vpop.f32.mrf.mxu0  ;;  %v481_v36 = vpop.f32.mrf.mxu1 }
  0xe7   : > { %v511_v37 = vadd.f32 %v471_v35, %v334_v33  ;;  %v515_v38 = vadd.f32 %v481_v36, %v338_v34 }
  0xe9   : > { %527 = vst [vmem:[#allocation2 + $0x30] sm:$0xff] %v511_v37 }
  0xea   : > { %531 = vst [vmem:[#allocation2 + $0x50] sm:$0xff] %v515_v38 }
  0xed   : > { %v491_v43 = vpop.f32.mrf.mxu2  ;;  %v501_v44 = vpop.f32.mrf.mxu3 }
  0xee   : > { %v519_v45 = vadd.f32 %v491_v43, %v342_v39  ;;  %v523_v46 = vadd.f32 %v501_v44, %v346_v40  ;;  %v473_v47 = vpop.f32.mrf.mxu0  ;;  %v483_v48 = vpop.f32.mrf.mxu1 }
  0xef   : > { %v512_v49 = vadd.f32 %v473_v47, %v335_v41  ;;  %v516_v50 = vadd.f32 %v483_v48, %v339_v42 }
  0xf0   : > { %535 = vst [vmem:[#allocation2 + $0x40] sm:$0xff] %v519_v45 }
  0xf1   : > { %539 = vst [vmem:[#allocation2 + $0x60] sm:$0xff] %v523_v46 }
  0xf2   : > { %528 = vst [vmem:[#allocation2] sm:$0xff] %v512_v49 }
  0xf3   : > { %532 = vst [vmem:[#allocation2 + $0x68] sm:$0xff] %v516_v50 }
  0xf5   : > { %v493_v55 = vpop.f32.mrf.mxu2  ;;  %v503_v56 = vpop.f32.mrf.mxu3 }
  0xf6   : > { %v520_v57 = vadd.f32 %v493_v55, %v343_v51  ;;  %v524_v58 = vadd.f32 %v503_v56, %v347_v52  ;;  %v476_v59 = vpop.f32.mrf.mxu0  ;;  %v486_v60 = vpop.f32.mrf.mxu1 }
  0xf7   : > { %v513_v61 = vadd.f32 %v476_v59, %v336_v53  ;;  %v517_v62 = vadd.f32 %v486_v60, %v340_v54 }
  0xf8   : > { %536 = vst [vmem:[#allocation2 + $0x20] sm:$0xff] %v520_v57 }
  0xf9   : > { %540 = vst [vmem:[#allocation2 + $0x70] sm:$0xff] %v524_v58 }
  0xfa   : > { %529 = vst [vmem:[#allocation2 + $0x58] sm:$0xff] %v513_v61 }
  0xfb   : > { %533 = vst [vmem:[#allocation2 + $0x8] sm:$0xff] %v517_v62 }
  0xfd   : > { %v496_v3 = vpop.f32.mrf.mxu2  ;;  %v506_v4 = vpop.f32.mrf.mxu3 }
  0xfe   : > { %v521_v5 = vadd.f32 %v496_v3, %v344_v63  ;;  %v525_v6 = vadd.f32 %v506_v4, %v348_v0  ;;  %v478_v7 = vpop.f32.mrf.mxu0  ;;  %v488_v8 = vpop.f32.mrf.mxu1 }
  0xff   : > { %v514_v9 = vadd.f32 %v478_v7, %v337_v1  ;;  %v518_v10 = vadd.f32 %v488_v8, %v341_v2 }
 0x100   : > { %537 = vst [vmem:[#allocation2 + $0x10] sm:$0xff] %v521_v5 }
 0x101   : > { %541 = vst [vmem:[#allocation2 + $0x78] sm:$0xff] %v525_v6 }
 0x102   : > { %530 = vst [vmem:[#allocation2 + $0x18] sm:$0xff] %v514_v9 }
 0x103   : > { %534 = vst [vmem:[#allocation2 + $0x48] sm:$0xff] %v518_v10 }
 0x105   : > { %v498_v13 = vpop.f32.mrf.mxu2  ;;  %v508_v14 = vpop.f32.mrf.mxu3  ;;  %546 = sbr.rel (%p788_p12) target bundleno = 282 (0x11a), region = 81 }
 0x106   : > { %v522_v15 = vadd.f32 %v498_v13, %v345_v11  ;;  %v526_v16 = vadd.f32 %v508_v14, %v349_v12 }
 0x108   : > { %538 = vst [vmem:[#allocation2 + $0x38] sm:$0xff] %v522_v15 }
 0x109   : > { %542 = vst [vmem:[#allocation2 + $0x28] sm:$0xff] %v526_v16 }
 0x10a   : > { %v547_v17 = vld [vmem:[#allocation2 + $0x30] sm:$0xff]  ;;  %v548_v18 = vld [vmem:[#allocation2] sm:$0xff]  ;;  %v549_v20 = vld [vmem:[#allocation2 + $0x58] sm:$0xff] }
 0x10b   : > { %v936_v19 = vld [vmem:[%s1161_s2] ss:$0 sm:$0xff]  ;;  %v550_v21 = vld [vmem:[#allocation2 + $0x18] sm:$0xff]  ;;  %v551_v22 = vld [vmem:[#allocation2 + $0x50] sm:$0xff] }
 0x10c   : > { %v552_v23 = vld [vmem:[#allocation2 + $0x68] sm:$0xff]  ;;  %v567_v25 = vadd.f32 %v936_v19, %v547_v17  ;;  %v568_v26 = vadd.f32 %v936_v19, %v548_v18  ;;  %v569_v27 = vadd.f32 %v936_v19, %v549_v20  ;;  %v570_v28 = vadd.f32 %v936_v19, %v550_v21  ;;  %v555_v34 = vld [vmem:[#allocation2 + $0x40] sm:$0xff]  ;;  %v557_v40 = vld [vmem:[#allocation2 + $0x10] sm:$0xff] }
 0x10d   : > { %v553_v24 = vld [vmem:[#allocation2 + $0x8] sm:$0xff]  ;;  %v571_v30 = vadd.f32 %v936_v19, %v551_v22  ;;  %v572_v31 = vadd.f32 %v936_v19, %v552_v23  ;;  %v556_v35 = vld [vmem:[#allocation2 + $0x20] sm:$0xff]  ;;  %v560_v47 = vld [vmem:[#allocation2 + $0x70] sm:$0xff]  ;;  %v575_v50 = vadd.f32 %v936_v19, %v555_v34  ;;  %v577_v56 = vadd.f32 %v936_v19, %v557_v40 }
 0x10e   : > { %v554_v29 = vld [vmem:[#allocation2 + $0x48] sm:$0xff]  ;;  %v573_v32 = vadd.f32 %v936_v19, %v553_v24  ;;  %v583_v36 = vmax.f32 %v567_v25, 0.0  ;;  %v584_v37 = vmax.f32 %v568_v26, 0.0  ;;  %v585_v38 = vmax.f32 %v569_v27, 0.0  ;;  %v559_v46 = vld [vmem:[#allocation2 + $0x60] sm:$0xff]  ;;  %v561_v52 = vld [vmem:[#allocation2 + $0x78] sm:$0xff] }
 0x10f   : > { %v574_v33 = vadd.f32 %v936_v19, %v554_v29  ;;  %v586_v39 = vmax.f32 %v570_v28, 0.0  ;;  %v558_v41 = vld [vmem:[#allocation2 + $0x38] sm:$0xff]  ;;  %v587_v42 = vmax.f32 %v571_v30, 0.0  ;;  %v588_v43 = vmax.f32 %v572_v31, 0.0 }
 0x110   : > { %v589_v44 = vmax.f32 %v573_v32, 0.0  ;;  %v811_v48 = vpack.c.bf16 %v584_v37, %v583_v36  ;;  %v576_v51 = vadd.f32 %v936_v19, %v556_v35  ;;  %v562_v53 = vld [vmem:[#allocation2 + $0x28] sm:$0xff]  ;;  %v578_v57 = vadd.f32 %v936_v19, %v558_v41 }
 0x111   : > { %v590_v45 = vmax.f32 %v574_v33, 0.0  ;;  %v816_v49 = vpack.c.bf16 %v586_v39, %v585_v38  ;;  %v821_v54 = vpack.c.bf16 %v588_v43, %v587_v42  ;;  %v591_v58 = vmax.f32 %v575_v50, 0.0 }
 0x112   : > { %812 = vst [vmem:[%s1099_s23] sm:$0xff] %v811_v48   ;;  %v592_v59 = vmax.f32 %v576_v51, 0.0  ;;  %v579_v60 = vadd.f32 %v936_v19, %v559_v46  ;;  %v580_v61 = vadd.f32 %v936_v19, %v560_v47  ;;  %v593_v62 = vmax.f32 %v577_v56, 0.0 }
 0x113   : > { %v826_v55 = vpack.c.bf16 %v590_v45, %v589_v44  ;;  %848 = vst [vmem:[%s1099_s23 + $0x8] sm:$0xff] %v816_v49   ;;  %v594_v63 = vmax.f32 %v578_v57, 0.0  ;;  %v581_v0 = vadd.f32 %v936_v19, %v561_v52  ;;  %v582_v1 = vadd.f32 %v936_v19, %v562_v53 }
 0x114   : > { %849 = vst [vmem:[%s1099_s23 + $0x10] sm:$0xff] %v821_v54   ;;  %v831_v2 = vpack.c.bf16 %v592_v59, %v591_v58  ;;  %v595_v3 = vmax.f32 %v579_v60, 0.0  ;;  %v596_v4 = vmax.f32 %v580_v61, 0.0 }
 0x115   : > { %850 = vst [vmem:[%s1099_s23 + $0x18] sm:$0xff] %v826_v55   ;;  %v836_v5 = vpack.c.bf16 %v594_v63, %v593_v62  ;;  %v597_v6 = vmax.f32 %v581_v0, 0.0  ;;  %v598_v7 = vmax.f32 %v582_v1, 0.0 }
 0x116   : > { %851 = vst [vmem:[%s1099_s23 + $0x20] sm:$0xff] %v831_v2   ;;  %v841_v8 = vpack.c.bf16 %v596_v4, %v595_v3 }
 0x117   : > { %852 = vst [vmem:[%s1099_s23 + $0x28] sm:$0xff] %v836_v5   ;;  %v846_v9 = vpack.c.bf16 %v598_v7, %v597_v6 }
 0x118   : > { %853 = vst [vmem:[%s1099_s23 + $0x30] sm:$0xff] %v841_v8  }
 0x119   : > { %854 = vst [vmem:[%s1099_s23 + $0x38] sm:$0xff] %v846_v9  }
 0x11a PF: > { %s13_s18 = sadd.s32 1, %s991_s18   ;;  %s1163_s12 = smov %s971_s13 }
 0x11b   : > { %p10_p13 = scmp.ge.s32.totalorder %s13_s18, 6   ;;  %s1164_s13 = smov %s1065_s25 }
 0x11c   : > { %s1165_s14 = smov %s983_s16  ;;  %s1166_s15 = smov %s987_s17 }
 0x11d   : > { %s1167_s16 = smov %s1170_s19  ;;  %s1168_s17 = smov %s1174_s20 }
 0x11e   :  { %12 = sbr.rel (!%p10_p13) target bundleno = 4 (0x4), region = 117 }

</bundles_post_ra>
